<compile_context>
chip_gen: v7x
topology: tpu7x:2x2x1
jax: 0.10.0
libtpu: 0.0.40
codegen_flags: <defaults>
</compile_context>

<pallas_src>
import math
from functools import partial

import jax
import jax.numpy as jnp
from jax.experimental import pallas as pl
from jax.experimental.pallas import tpu as pltpu

_VMEM = pltpu.MemorySpace.VMEM
_LANE = 128          # lane-dense padded width for every hidden / output layer
_IN = 28 * 28        # 784
_OUT = 10            # real number of classes (columns 10..127 are zero padding)

_FAST_MAX_ROWS = 1024        # gridless fused path up to this many rows
_DEFAULT_BLOCK_ROWS = 512    # row tile for the streamed path (fits v5e's 16 MiB default)


# --------------------------- shared layer stack ---------------------------

def _mlp_stack(x, w1, b1, w2, b2, w3, b3, w4, b4):
    """4x (Linear -> ReLU). bf16 MXU operands, f32 accumulation / elementwise."""
    h = x
    for w, b in ((w1, b1), (w2, b2), (w3, b3), (w4, b4)):
        h = jnp.dot(h.astype(jnp.bfloat16), w,
                    preferred_element_type=jnp.float32) + b
        h = jnp.maximum(h, 0.0)
    return h  # (rows, 128) float32, >= 0 everywhere (post-ReLU)


# --------------------------- kernels ---------------------------

def _fnn_fast_kernel(x_ref, w1_ref, b1_ref, w2_ref, b2_ref, w3_ref, b3_ref,
                     w4_ref, b4_ref, out_ref):
    """Fully fused small-batch path: MLP + log_softmax over dim 0 (batch)."""
    h = _mlp_stack(x_ref[...], w1_ref[...], b1_ref[...], w2_ref[...],
                   b2_ref[...], w3_ref[...], b3_ref[...], w4_ref[...],
                   b4_ref[...])
    m = jnp.max(h, axis=0, keepdims=True)
    z = h - m
    lse = jnp.log(jnp.sum(jnp.exp(z), axis=0, keepdims=True))
    # Narrow to the 10 real classes inside the kernel (no post-kernel slice op).
    out_ref[...] = (z - lse)[:, :_OUT]


def _make_pass1_kernel(n_rows, block_rows):
    """Tiled pass 1: MLP per row tile + per-tile per-column softmax stats."""
    need_mask = (n_rows % block_rows) != 0

    def kernel(x_ref, w1_ref, b1_ref, w2_ref, b2_ref, w3_ref, b3_ref,
               w4_ref, b4_ref, h_ref, m_ref, s_ref):
        h = _mlp_stack(x_ref[...], w1_ref[...], b1_ref[...], w2_ref[...],
                       b2_ref[...], w3_ref[...], b3_ref[...], w4_ref[...],
                       b4_ref[...])
        h_ref[...] = h  # unnormalized (ReLU'd) logits slab, f32

        if need_mask:
            # Rows past n_rows (zero-padding of the ragged last tile) must not
            # contribute to the dim-0 softmax statistics.
            base = pl.program_id(0) * block_rows
            rows = base + jax.lax.broadcasted_iota(jnp.int32, (block_rows, 1), 0)
            valid = rows < n_rows
            # h >= 0 after ReLU, so masking with 0.0 never raises the max.
            m_t = jnp.max(jnp.where(valid, h, 0.0), axis=0, keepdims=True)
            p = jnp.where(valid, jnp.exp(h - m_t), 0.0)
        else:
            m_t = jnp.max(h, axis=0, keepdims=True)
            p = jnp.exp(h - m_t)

        s_t = jnp.sum(p, axis=0, keepdims=True)
        m_ref[...] = m_t.reshape(1, 1, _LANE)
        s_ref[...] = s_t.reshape(1, 1, _LANE)

    return kernel


def _normalize_kernel(h_ref, lse_ref, out_ref):
    """Tiled pass 2: subtract the per-column logsumexp and narrow to 10 cols."""
    out_ref[...] = (h_ref[...] - lse_ref[...])[:, :_OUT]


# --------------------------- wrappers ---------------------------

def _param_bytes(params):
    return sum(int(p.size) * p.dtype.itemsize
               for p in jax.tree_util.tree_leaves(params))


@jax.jit
def _forward_fast(params, x):
    """Gridless fused path for small batches (whole batch VMEM-resident)."""
    n = x.shape[0]
    pbytes = _param_bytes(params)
    # Explicit scoped-VMEM budget (v5e default is only 16 MiB): x + params +
    # a handful of (n,128) f32 temporaries + narrow output, with 2x headroom.
    need = pbytes + n * _IN * x.dtype.itemsize + 8 * n * _LANE * 4 + n * _OUT * 4
    limit = int(min(2 * need + (2 << 20), 48 << 20))

    cost = pl.CostEstimate(
        flops=2 * n * (_IN * _LANE + 3 * _LANE * _LANE),
        transcendentals=n * _LANE + _LANE,
        bytes_accessed=n * _IN * x.dtype.itemsize + pbytes + n * _OUT * 4,
    )

    return pl.pallas_call(
        _fnn_fast_kernel,
        out_shape=jax.ShapeDtypeStruct((n, _OUT), jnp.float32),
        in_specs=[pl.BlockSpec(memory_space=_VMEM)] * 9,
        out_specs=pl.BlockSpec(memory_space=_VMEM),
        compiler_params=pltpu.CompilerParams(vmem_limit_bytes=limit),
        cost_estimate=cost,
    )(x, params["w1"], params["b1"], params["w2"], params["b2"],
      params["w3"], params["b3"], params["w4"], params["b4"])


@partial(jax.jit, static_argnames=("block_rows",))
def _forward_tiled(params, x, block_rows):
    """Streamed path: row-tiled MLP with a parallel two-pass dim-0 log_softmax."""
    n = x.shape[0]
    t = pl.cdiv(n, block_rows)
    n_pad = t * block_rows
    if n_pad != n:
        x = jnp.pad(x, ((0, n_pad - n), (0, 0)))

    const2 = lambda i: (0, 0)
    row_tile = lambda i: (i, 0)

    # Weights / biases: constant index_map -> VMEM-resident across grid steps.
    param_in_specs = [
        pl.BlockSpec((_IN, _LANE), const2),     # w1 (bf16)
        pl.BlockSpec((1, _LANE), const2),       # b1 (f32)
        pl.BlockSpec((_LANE, _LANE), const2),   # w2
        pl.BlockSpec((1, _LANE), const2),       # b2
        pl.BlockSpec((_LANE, _LANE), const2),   # w3
        pl.BlockSpec((1, _LANE), const2),       # b3
        pl.BlockSpec((_LANE, _LANE), const2),   # w4
        pl.BlockSpec((1, _LANE), const2),       # b4
    ]

    pbytes = _param_bytes(params)
    cost1 = pl.CostEstimate(
        flops=2 * n_pad * (_IN * _LANE + 3 * _LANE * _LANE),
        transcendentals=n_pad * _LANE,
        bytes_accessed=(n_pad * _IN * x.dtype.itemsize + pbytes
                        + n_pad * _LANE * 4 + 2 * t * _LANE * 4),
    )

    # ---- pass 1: logits slab + per-tile per-column (max, sum-exp) stats ----
    h_slab, m_part, s_part = pl.pallas_call(
        _make_pass1_kernel(n, block_rows),
        out_shape=(
            jax.ShapeDtypeStruct((n_pad, _LANE), jnp.float32),  # logits slab
            jax.ShapeDtypeStruct((t, 1, _LANE), jnp.float32),   # per-tile max
            jax.ShapeDtypeStruct((t, 1, _LANE), jnp.float32),   # per-tile sum-exp
        ),
        grid=(t,),
        in_specs=[pl.BlockSpec((block_rows, _IN), row_tile)] + param_in_specs,
        out_specs=(
            pl.BlockSpec((block_rows, _LANE), row_tile),
            pl.BlockSpec((1, 1, _LANE), lambda i: (i, 0, 0)),
            pl.BlockSpec((1, 1, _LANE), lambda i: (i, 0, 0)),
        ),
        compiler_params=pltpu.CompilerParams(dimension_semantics=("parallel",)),
        cost_estimate=cost1,
    )(x, params["w1"], params["b1"], params["w2"], params["b2"],
      params["w3"], params["b3"], params["w4"], params["b4"])

    # ---- tiny combine of per-tile stats -> per-column logsumexp (XLA) ----
    m_all = m_part[:, 0, :]                              # (t, 128)
    s_all = s_part[:, 0, :]
    m_g = jnp.max(m_all, axis=0)                         # (128,)
    lse = m_g + jnp.log(jnp.sum(s_all * jnp.exp(m_all - m_g[None, :]), axis=0))
    lse = lse.reshape(1, _LANE)

    # ---- pass 2: normalize and narrow to the 10 real classes ----
    out_pad = pl.pallas_call(
        _normalize_kernel,
        out_shape=jax.ShapeDtypeStruct((n_pad, _OUT), jnp.float32),
        grid=(t,),
        in_specs=[
            pl.BlockSpec((block_rows, _LANE), row_tile),
            pl.BlockSpec((1, _LANE), const2),
        ],
        out_specs=pl.BlockSpec((block_rows, _OUT), row_tile),
        compiler_params=pltpu.CompilerParams(dimension_semantics=("parallel",)),
    )(h_slab, lse)

    return out_pad[:n] if n_pad != n else out_pad


def fnn_forward(params, x, *, block_rows=_DEFAULT_BLOCK_ROWS):
    """x: (N, 784) (or flattenable) float32/bf16 -> (N, 10) log_softmax(dim=0)."""
    x = x.reshape(x.shape[0], _IN)
    if x.dtype != jnp.bfloat16:          # accept bf16 to halve the x HBM read
        x = x.astype(jnp.float32)
    if x.shape[0] <= _FAST_MAX_ROWS:
        return _forward_fast(params, x)
    return _forward_tiled(params, x, block_rows=block_rows)


# --------------------------- deterministic params ---------------------------

def _linear_params(key, fan_in, fan_out, pad_in, pad_out):
    """PyTorch nn.Linear default init, stored (in, out), zero-padded lane-dense.

    Weights are stored bf16 (native MXU dtype); biases stay f32.
    """
    kw, kb = jax.random.split(key)
    bound = 1.0 / math.sqrt(fan_in)
    w = jax.random.uniform(kw, (fan_in, fan_out), jnp.float32, -bound, bound)
    b = jax.random.uniform(kb, (fan_out,), jnp.float32, -bound, bound)
    w_pad = jnp.zeros((pad_in, pad_out), jnp.float32).at[:fan_in, :fan_out].set(w)
    b_pad = jnp.zeros((1, pad_out), jnp.float32).at[0, :fan_out].set(b)
    return w_pad.astype(jnp.bfloat16), b_pad


def init_params(key):
    k1, k2, k3, k4 = jax.random.split(key, 4)
    w1, b1 = _linear_params(k1, _IN, 128, _IN, _LANE)
    w2, b2 = _linear_params(k2, 128, 64, _LANE, _LANE)
    w3, b3 = _linear_params(k3, 64, 32, _LANE, _LANE)
    w4, b4 = _linear_params(k4, 32, _OUT, _LANE, _LANE)
    return dict(w1=w1, b1=b1, w2=w2, b2=b2, w3=w3, b3=b3, w4=w4, b4=b4)


def fnn_reference(params, x):
    """Pure-JAX reference using the same bf16-operand / f32-accumulate recipe."""
    h = x.reshape(x.shape[0], _IN).astype(jnp.float32)
    for wk, bk in (("w1", "b1"), ("w2", "b2"), ("w3", "b3"), ("w4", "b4")):
        h = jnp.dot(h.astype(jnp.bfloat16), params[wk],
                    preferred_element_type=jnp.float32) + params[bk]
        h = jnp.maximum(h, 0.0)
    return jax.nn.log_softmax(h, axis=0)[:, :_OUT]


# --------------------------- demo / self-check ---------------------------

if __name__ == "__main__":
    key = jax.random.PRNGKey(0)
    params = init_params(jax.random.fold_in(key, 1))

    # Small batch of flattened 28x28 "images" -> fused gridless fast path.
    x_small = jax.random.normal(jax.random.fold_in(key, 2), (8, _IN), jnp.float32)
    out_small = fnn_forward(params, x_small)
    jax.block_until_ready(out_small)

    assert out_small.shape == (8, _OUT), out_small.shape
    assert bool(jnp.all(jnp.isfinite(out_small)))
    # log_softmax over dim=0 => exp(out) sums to 1 along the batch axis per column.
    col_sums = jnp.sum(jnp.exp(out_small), axis=0)
    assert bool(jnp.all(jnp.abs(col_sums - 1.0) < 1e-3)), col_sums
    ref_small = fnn_reference(params, x_small)
    assert bool(jnp.max(jnp.abs(out_small - ref_small)) < 2e-2)

    # Medium batch -> streamed/tiled path (3 row tiles incl. a ragged tail).
    n_med = 640
    x_med = jax.random.normal(jax.random.fold_in(key, 3), (n_med, _IN), jnp.float32)
    out_tiled = _forward_tiled(params, x_med, block_rows=256)
    out_fast = _forward_fast(params, x_med)
    jax.block_until_ready((out_tiled, out_fast))

    assert out_tiled.shape == (n_med, _OUT), out_tiled.shape
    assert bool(jnp.all(jnp.isfinite(out_tiled)))
    col_sums_t = jnp.sum(jnp.exp(out_tiled), axis=0)
    assert bool(jnp.all(jnp.abs(col_sums_t - 1.0) < 1e-3)), col_sums_t
    # Tiled two-pass softmax must agree with the fused single-tile path.
    assert bool(jnp.max(jnp.abs(out_tiled - out_fast)) < 1e-4)

    print("KERNEL_OK")
</pallas_src>

<mosaic_0001>
module attributes {stable_mosaic.version = 11 : i64} {
  func.func @_fnn_fast_kernel(%arg0: memref<8x784xf32, #tpu.memory_space<vmem>>, %arg1: memref<784x128xbf16, #tpu.memory_space<vmem>>, %arg2: memref<1x128xf32, #tpu.memory_space<vmem>>, %arg3: memref<128x128xbf16, #tpu.memory_space<vmem>>, %arg4: memref<1x128xf32, #tpu.memory_space<vmem>>, %arg5: memref<128x128xbf16, #tpu.memory_space<vmem>>, %arg6: memref<1x128xf32, #tpu.memory_space<vmem>>, %arg7: memref<128x128xbf16, #tpu.memory_space<vmem>>, %arg8: memref<1x128xf32, #tpu.memory_space<vmem>>, %arg9: memref<8x10xf32, #tpu.memory_space<vmem>>) attributes {dimension_semantics = [], scalar_prefetch = 0 : i64, scratch_operands = 0 : i64, tpu.core_type = #tpu.core_type<tc>} {
    %c0 = arith.constant 0 : index
    %c0_0 = arith.constant 0 : index
    %0 = vector.load %arg0[%c0, %c0_0] : memref<8x784xf32, #tpu.memory_space<vmem>>, vector<8x784xf32>
    %c0_1 = arith.constant 0 : index
    %c0_2 = arith.constant 0 : index
    %1 = vector.load %arg1[%c0_1, %c0_2] : memref<784x128xbf16, #tpu.memory_space<vmem>>, vector<784x128xbf16>
    %c0_3 = arith.constant 0 : index
    %c0_4 = arith.constant 0 : index
    %2 = vector.load %arg2[%c0_3, %c0_4] : memref<1x128xf32, #tpu.memory_space<vmem>>, vector<1x128xf32>
    %c0_5 = arith.constant 0 : index
    %c0_6 = arith.constant 0 : index
    %3 = vector.load %arg3[%c0_5, %c0_6] : memref<128x128xbf16, #tpu.memory_space<vmem>>, vector<128x128xbf16>
    %c0_7 = arith.constant 0 : index
    %c0_8 = arith.constant 0 : index
    %4 = vector.load %arg4[%c0_7, %c0_8] : memref<1x128xf32, #tpu.memory_space<vmem>>, vector<1x128xf32>
    %c0_9 = arith.constant 0 : index
    %c0_10 = arith.constant 0 : index
    %5 = vector.load %arg5[%c0_9, %c0_10] : memref<128x128xbf16, #tpu.memory_space<vmem>>, vector<128x128xbf16>
    %c0_11 = arith.constant 0 : index
    %c0_12 = arith.constant 0 : index
    %6 = vector.load %arg6[%c0_11, %c0_12] : memref<1x128xf32, #tpu.memory_space<vmem>>, vector<1x128xf32>
    %c0_13 = arith.constant 0 : index
    %c0_14 = arith.constant 0 : index
    %7 = vector.load %arg7[%c0_13, %c0_14] : memref<128x128xbf16, #tpu.memory_space<vmem>>, vector<128x128xbf16>
    %c0_15 = arith.constant 0 : index
    %c0_16 = arith.constant 0 : index
    %8 = vector.load %arg8[%c0_15, %c0_16] : memref<1x128xf32, #tpu.memory_space<vmem>>, vector<1x128xf32>
    %9 = arith.truncf %0 : vector<8x784xf32> to vector<8x784xbf16>
    %cst = arith.constant dense<0.000000e+00> : vector<8x128xf32>
    %10 = tpu.matmul %9, %1, %cst {dimension_numbers = #tpu.dot_dimension_numbers<[1], [0], [0], [1], [0, 0, 1, 1], [], []>} : vector<8x784xbf16>, vector<784x128xbf16>, vector<8x128xf32> -> vector<8x128xf32>
    %11 = vector.broadcast %2 : vector<1x128xf32> to vector<8x128xf32>
    %12 = arith.addf %10, %11 : vector<8x128xf32>
    %cst_17 = arith.constant 0.000000e+00 : f32
    %13 = vector.broadcast %cst_17 : f32 to vector<8x128xf32>
    %14 = arith.maximumf %12, %13 : vector<8x128xf32>
    %15 = arith.truncf %14 : vector<8x128xf32> to vector<8x128xbf16>
    %cst_18 = arith.constant dense<0.000000e+00> : vector<8x128xf32>
    %16 = tpu.matmul %15, %3, %cst_18 {dimension_numbers = #tpu.dot_dimension_numbers<[1], [0], [0], [1], [0, 0, 1, 1], [], []>} : vector<8x128xbf16>, vector<128x128xbf16>, vector<8x128xf32> -> vector<8x128xf32>
    %17 = vector.broadcast %4 : vector<1x128xf32> to vector<8x128xf32>
    %18 = arith.addf %16, %17 : vector<8x128xf32>
    %cst_19 = arith.constant 0.000000e+00 : f32
    %19 = vector.broadcast %cst_19 : f32 to vector<8x128xf32>
    %20 = arith.maximumf %18, %19 : vector<8x128xf32>
    %21 = arith.truncf %20 : vector<8x128xf32> to vector<8x128xbf16>
    %cst_20 = arith.constant dense<0.000000e+00> : vector<8x128xf32>
    %22 = tpu.matmul %21, %5, %cst_20 {dimension_numbers = #tpu.dot_dimension_numbers<[1], [0], [0], [1], [0, 0, 1, 1], [], []>} : vector<8x128xbf16>, vector<128x128xbf16>, vector<8x128xf32> -> vector<8x128xf32>
    %23 = vector.broadcast %6 : vector<1x128xf32> to vector<8x128xf32>
    %24 = arith.addf %22, %23 : vector<8x128xf32>
    %cst_21 = arith.constant 0.000000e+00 : f32
    %25 = vector.broadcast %cst_21 : f32 to vector<8x128xf32>
    %26 = arith.maximumf %24, %25 : vector<8x128xf32>
    %27 = arith.truncf %26 : vector<8x128xf32> to vector<8x128xbf16>
    %cst_22 = arith.constant dense<0.000000e+00> : vector<8x128xf32>
    %28 = tpu.matmul %27, %7, %cst_22 {dimension_numbers = #tpu.dot_dimension_numbers<[1], [0], [0], [1], [0, 0, 1, 1], [], []>} : vector<8x128xbf16>, vector<128x128xbf16>, vector<8x128xf32> -> vector<8x128xf32>
    %29 = vector.broadcast %8 : vector<1x128xf32> to vector<8x128xf32>
    %30 = arith.addf %28, %29 : vector<8x128xf32>
    %cst_23 = arith.constant 0.000000e+00 : f32
    %31 = vector.broadcast %cst_23 : f32 to vector<8x128xf32>
    %32 = arith.maximumf %30, %31 : vector<8x128xf32>
    %cst_24 = arith.constant dense<0xFF800000> : vector<128xf32>
    %33 = vector.multi_reduction <maximumf>, %32, %cst_24 [0] : vector<8x128xf32> to vector<128xf32>
    %34 = vector.shape_cast %33 : vector<128xf32> to vector<1x128xf32>
    %35 = vector.broadcast %34 : vector<1x128xf32> to vector<8x128xf32>
    %36 = arith.subf %32, %35 : vector<8x128xf32>
    %37 = math.exp %36 : vector<8x128xf32>
    %cst_25 = arith.constant dense<0.000000e+00> : vector<128xf32>
    %38 = vector.multi_reduction <add>, %37, %cst_25 [0] : vector<8x128xf32> to vector<128xf32>
    %39 = vector.shape_cast %38 : vector<128xf32> to vector<1x128xf32>
    %40 = math.log %39 : vector<1x128xf32>
    %41 = vector.broadcast %40 : vector<1x128xf32> to vector<8x128xf32>
    %42 = arith.subf %36, %41 : vector<8x128xf32>
    %43 = vector.extract_strided_slice %42 {offsets = [0, 0], sizes = [8, 10], strides = [1, 1]} : vector<8x128xf32> to vector<8x10xf32>
    %c0_26 = arith.constant 0 : index
    %c0_27 = arith.constant 0 : index
    %44 = vector.load %arg9[%c0_26, %c0_27] : memref<8x10xf32, #tpu.memory_space<vmem>>, vector<8x10xf32>
    tpu.vector_store %arg9[%c0_26, %c0_27], %43 {strides = array<i32>} : memref<8x10xf32, #tpu.memory_space<vmem>>, vector<8x10xf32>,
    return
  }
}

</mosaic_0001>

<bundles_post_ra>
// kernel: _forward_fast.1
= control target key start
LH: loop header
LB: loop body
LE: loop exit
PB: predicated region body
PF: predicated region fallthrough
CT: control target
= control target key end

     0   :  { %14 = vsyncpa [#allocation3], 0  ;;  %s1757_s0 = inlined_call_operand.hbm [shape: f32[8,784], index: 0, kind: input, shape index: {}]   ;;  %s1758_s1 = inlined_call_operand.hbm [shape: bf16[784,128], index: 1, kind: input, shape index: {}]   ;;  %s1759_s2 = inlined_call_operand.hbm [shape: f32[1,128], index: 2, kind: input, shape index: {}]   ;;  %s1760_s3 = inlined_call_operand.hbm [shape: bf16[128,128], index: 3, kind: input, shape index: {}]   ;;  %s1761_s4 = inlined_call_operand.vmem [shape: f32[1,128], index: 4, kind: input, shape index: {}]   ;;  %s1762_s5 = inlined_call_operand.hbm [shape: bf16[128,128], index: 5, kind: input, shape index: {}]   ;;  %s1763_s6 = inlined_call_operand.vmem [shape: f32[1,128], index: 6, kind: input, shape index: {}]   ;;  %s1764_s7 = inlined_call_operand.hbm [shape: bf16[128,128], index: 7, kind: input, shape index: {}]   ;;  %s1765_s8 = inlined_call_operand.vmem [shape: f32[1,128], index: 8, kind: input, shape index: {}]   ;;  %s1766_s9 = inlined_call_operand.hbm [shape: f32[8,10], index: 9, kind: output, shape index: {}]  }
   0x1   :  { %15 = vsyncpa [#allocation6], 0 }
   0x2   :  { %16 = vsyncpa [#allocation9], 0 }
   0x3   :  { %17 = vsyncpa [#allocation12], 0 }
   0x4   :  { %18 = vsyncpa [#allocation4], 0  ;;  %s1558_s30 = smov [#allocation5]   ;;  %s1394_s13 = scalar_lea.hbm %s1758_s1, 6272 }
   0x5   :  { %s34_s10 = sshll.u32 %s1558_s30, 4  ;;  %p1395_p0 = scmp.ne.s32.totalorder %s1758_s1, %s1394_s13  ;;  %s35_s10 = int_to_ptr.vmem [resolvable:$true] %s34_s10 }
   0x6   :  { %p1398_p1 = scmp.lt.u32.totalorder %s1394_s13, %s1758_s1 }
   0x8   :  { %p1400_p2 = pnand %p1398_p1, %p1395_p0 }
   0xa   :  { %1403 = shalt.err (!%p1400_p2)
}
   0xb   :  { %s1404_s18 = scalar_lea.vmem %s35_s10, 6272  ;;  %p1409_p4 = scmp.lt.s32.totalorder %s35_s10, %s35_s10 }
   0xc   :  { %p1405_p3 = scmp.ne.s32.totalorder %s35_s10, %s1404_s18  ;;  %p1410_p5 = scmp.lt.s32.totalorder %s1404_s18, %s1404_s18 }
   0xe   :  { %p1411_p6 = por %p1410_p5, %p1409_p4 }
  0x10   :  { %p1412_p7 = pnand %p1411_p6, %p1405_p3 }
  0x12   :  { %1415 = shalt.err (!%p1412_p7)
}
  0x13   :  { %s1559_s19 = smov 64   ;;  %s1560_s20 = smov 4  }
  0x14   :  { %40 = dma.hbm_to_vmem [thread:$0]  %s1758_s1, 6272, %s35_s10, [#allocation6], %s1559_s19, %s1559_s19, %s1560_s20  }
  0x15   :  { %s1561_s23 = smov [#allocation8]   ;;  %s1562_s25 = smov [#allocation2]  }
  0x16   :  { %s56_s24 = sshll.u32 %s1561_s23, 4  ;;  %s25_s26 = sshll.u32 %s1562_s25, 4  ;;  %s57_s24 = int_to_ptr.vmem [resolvable:$true] %s56_s24  ;;  %s26_s26 = int_to_ptr.vmem [resolvable:$true] %s25_s26 }
  0x17   :  { %s1416_s29 = scalar_lea.hbm %s1760_s3, 1024 }
  0x18   :  { %p1417_p8 = scmp.ne.s32.totalorder %s1760_s3, %s1416_s29  ;;  %p1420_p9 = scmp.lt.u32.totalorder %s1416_s29, %s1760_s3 }
  0x1a   :  { %p1422_p10 = pnand %p1420_p9, %p1417_p8 }
  0x1c   :  { %1425 = shalt.err (!%p1422_p10)
}
  0x1d   :  { %s1426_s1 = scalar_lea.vmem %s57_s24, 1024  ;;  %p1431_p12 = scmp.lt.s32.totalorder %s57_s24, %s57_s24 }
  0x1e   :  { %p1427_p11 = scmp.ne.s32.totalorder %s57_s24, %s1426_s1  ;;  %p1432_p13 = scmp.lt.s32.totalorder %s1426_s1, %s1426_s1 }
  0x20   :  { %p1433_p0 = por %p1432_p13, %p1431_p12 }
  0x22   :  { %p1434_p1 = pnand %p1433_p0, %p1427_p11 }
  0x24   :  { %1437 = shalt.err (!%p1434_p1)
}
  0x25   :  { %62 = dma.hbm_to_vmem [thread:$0]  %s1760_s3, 1024, %s57_s24, [#allocation9], %s1559_s19, %s1559_s19, %s1560_s20  }
  0x26   :  { %s1438_s17 = scalar_lea.hbm %s1757_s0, 896 }
  0x27   :  { %p1439_p2 = scmp.ne.s32.totalorder %s1757_s0, %s1438_s17  ;;  %p1442_p3 = scmp.lt.u32.totalorder %s1438_s17, %s1757_s0 }
  0x29   :  { %p1444_p4 = pnand %p1442_p3, %p1439_p2 }
  0x2b   :  { %1447 = shalt.err (!%p1444_p4)
}
  0x2c   :  { %s1448_s25 = scalar_lea.vmem %s26_s26, 896  ;;  %p1453_p6 = scmp.lt.s32.totalorder %s26_s26, %s26_s26 }
  0x2d   :  { %p1449_p5 = scmp.ne.s32.totalorder %s26_s26, %s1448_s25  ;;  %p1454_p7 = scmp.lt.s32.totalorder %s1448_s25, %s1448_s25 }
  0x2f   :  { %p1455_p8 = por %p1454_p7, %p1453_p6 }
  0x31   :  { %p1456_p9 = pnand %p1455_p8, %p1449_p5 }
  0x33   :  { %1459 = shalt.err (!%p1456_p9)
}
  0x34   :  { %28 = dma.hbm_to_vmem [thread:$0]  %s1757_s0, 896, %s26_s26, [#allocation3]  }
  0x35   :  { %s1563_s27 = smov [#allocation7]   ;;  %s1564_s29 = smov [#allocation10]  }
  0x36   :  { %s47_s28 = sshll.u32 %s1563_s27, 4  ;;  %s70_s30 = sshll.u32 %s1564_s29, 4  ;;  %s48_s28 = int_to_ptr.vmem [resolvable:$true] %s47_s28  ;;  %s71_s30 = int_to_ptr.vmem [resolvable:$true] %s70_s30 }
  0x37   :  { %s1460_s13 = scalar_lea.hbm %s1759_s2, 16 }
  0x38   :  { %p1461_p10 = scmp.ne.s32.totalorder %s1759_s2, %s1460_s13  ;;  %p1464_p11 = scmp.lt.u32.totalorder %s1460_s13, %s1759_s2 }
  0x3a   :  { %p1466_p12 = pnand %p1464_p11, %p1461_p10 }
  0x3c   :  { %1469 = shalt.err (!%p1466_p12)
}
  0x3d   :  { %s1470_s0 = scalar_lea.vmem %s48_s28, 16  ;;  %s1474_s26 = scalar_lea.vmem %s48_s28, 32 }
  0x3e   :  { %p1471_p13 = scmp.ne.s32.totalorder %s48_s28, %s1470_s0  ;;  %p1475_p0 = scmp.lt.s32.totalorder %s48_s28, %s48_s28 }
  0x3f   :  { %p1476_p1 = scmp.lt.s32.totalorder %s1474_s26, %s1470_s0 }
  0x41   :  { %p1477_p2 = por %p1476_p1, %p1475_p0 }
  0x43   :  { %p1478_p3 = pnand %p1477_p2, %p1471_p13 }
  0x45   :  { %1481 = shalt.err (!%p1478_p3)
}
  0x46   :  { %50 = dma.hbm_to_vmem [thread:$0]  %s1759_s2, 16, %s48_s28, [#allocation6]  }
  0x47   :  { %s1482_s22 = scalar_lea.hbm %s1762_s5, 1024 }
  0x48   :  { %p1483_p4 = scmp.ne.s32.totalorder %s1762_s5, %s1482_s22  ;;  %p1486_p5 = scmp.lt.u32.totalorder %s1482_s22, %s1762_s5 }
  0x4a   :  { %p1488_p6 = pnand %p1486_p5, %p1483_p4 }
  0x4c   :  { %1491 = shalt.err (!%p1488_p6)
}
  0x4d   :  { %s1492_s27 = scalar_lea.vmem %s71_s30, 1024  ;;  %p1497_p8 = scmp.lt.s32.totalorder %s71_s30, %s71_s30 }
  0x4e   :  { %p1493_p7 = scmp.ne.s32.totalorder %s71_s30, %s1492_s27  ;;  %p1498_p9 = scmp.lt.s32.totalorder %s1492_s27, %s1492_s27 }
  0x50   :  { %p1499_p10 = por %p1498_p9, %p1497_p8 }
  0x52   :  { %p1500_p11 = pnand %p1499_p10, %p1493_p7 }
  0x54   :  { %1503 = shalt.err (!%p1500_p11)
}
  0x55   :  { %76 = dma.hbm_to_vmem [thread:$0]  %s1762_s5, 1024, %s71_s30, [#allocation9], %s1559_s19, %s1559_s19, %s1560_s20  }
  0x56   :  { %s1565_s29 = smov [#allocation11]   ;;  %s1504_s1 = scalar_lea.hbm %s1764_s7, 1024 }
  0x57   :  { %s84_s11 = sshll.u32 %s1565_s29, 4  ;;  %p1505_p12 = scmp.ne.s32.totalorder %s1764_s7, %s1504_s1  ;;  %s85_s11 = int_to_ptr.vmem [resolvable:$true] %s84_s11 }
  0x58   :  { %p1508_p13 = scmp.lt.u32.totalorder %s1504_s1, %s1764_s7 }
  0x5a   :  { %p1510_p0 = pnand %p1508_p13, %p1505_p12 }
  0x5c   :  { %1513 = shalt.err (!%p1510_p0)
}
  0x5d   :  { %s1514_s26 = scalar_lea.vmem %s85_s11, 1024  ;;  %p1519_p2 = scmp.lt.s32.totalorder %s85_s11, %s85_s11 }
  0x5e   :  { %p1515_p1 = scmp.ne.s32.totalorder %s85_s11, %s1514_s26  ;;  %p1520_p3 = scmp.lt.s32.totalorder %s1514_s26, %s1514_s26 }
  0x60   :  { %p1521_p4 = por %p1520_p3, %p1519_p2 }
  0x62   :  { %p1522_p5 = pnand %p1521_p4, %p1515_p1 }
  0x64   :  { %1525 = shalt.err (!%p1522_p5)
}
  0x65   :  { %90 = dma.hbm_to_vmem [thread:$0]  %s1764_s7, 1024, %s85_s11, [#allocation12], %s1559_s19, %s1559_s19, %s1560_s20  }
  0x66   :  { %1548 = dma.done.wait [#allocation3], 896  }
  0x67   :  { %1549 = vsyncadd [#allocation3], 4294966400 }
  0x68   :  { %1550 = dma.done.wait [#allocation6], 6288  }
  0x69   :  { %1551 = vsyncadd [#allocation6], 4294961008 }
  0x6a   :  { %1552 = dma.done.wait [#allocation9], 2048  }
  0x6b   :  { %1553 = vsyncadd [#allocation9], 4294965248 }
  0x6c   :  { %1554 = dma.done.wait [#allocation12], 1024  }
  0x6d   :  { %1555 = vsyncadd [#allocation12], 4294966272  ;;  %v1317_v0 = vld [vmem:[#allocation5 + $0x40] sm:$0xff]   ;;  %v1321_v4 = vld [vmem:[#allocation5 + $0x48] sm:$0xff]   ;;  %v1566_v44 = vmov 0.0   ;;  %vm1567_vm0 = vmmov 0  }
  0x6e   :  { %v1318_v1 = vld [vmem:[#allocation5] sm:$0xff]   ;;  %1145 = vmatprep.subr.bf16.mxu0 %v1317_v0  ;;  %v1322_v5 = vld [vmem:[#allocation5 + $0x8] sm:$0xff]   ;;  %v1325_v8 = vld [vmem:[#allocation5 + $0x50] sm:$0xff]   ;;  %vm576_vm1 = vcmask 130048   ;;  %vm1047_vm2 = vcmask 80896  }
  0x6f   :  { %v1319_v2 = vld [vmem:[#allocation5 + $0xc0] sm:$0xff]   ;;  %1146 = vmatpush3.bf16.msra.mxu0 %v1318_v1  ;;  %v1323_v6 = vld [vmem:[#allocation5 + $0xc8] sm:$0xff]   ;;  %v1326_v9 = vld [vmem:[#allocation5 + $0x10] sm:$0xff]  }
  0x70   :  { %v1320_v3 = vld [vmem:[#allocation5 + $0x80] sm:$0xff]   ;;  %1167 = vmatprep.subr.bf16.mxu1 %v1319_v2  ;;  %1147 = vmatprep.subr.bf16.mxu0 %v1321_v4  ;;  %v1324_v7 = vld [vmem:[#allocation5 + $0x88] sm:$0xff]   ;;  %v1327_v10 = vld [vmem:[#allocation5 + $0xd0] sm:$0xff]  }
  0x71   :  { %1168 = vmatpush3.bf16.msra.mxu1 %v1320_v3  ;;  %v1328_v11 = vld [vmem:[#allocation5 + $0x90] sm:$0xff]   ;;  %v1329_v12 = vld [vmem:[#allocation5 + $0x58] sm:$0xff]   ;;  %v1333_v16 = vld [vmem:[#allocation5 + $0x60] sm:$0xff]  }
  0x72   :  { %1169 = vmatprep.subr.bf16.mxu1 %v1323_v6  ;;  %v1330_v13 = vld [vmem:[#allocation5 + $0x18] sm:$0xff]   ;;  %v1334_v17 = vld [vmem:[#allocation5 + $0x20] sm:$0xff]   ;;  %v1337_v20 = vld [vmem:[#allocation5 + $0x68] sm:$0xff]  }
  0x73   :  { %1148 = vmatpush3.bf16.msra.mxu0 %v1322_v5  ;;  %v1331_v14 = vld [vmem:[#allocation5 + $0xd8] sm:$0xff]   ;;  %v1335_v18 = vld [vmem:[#allocation5 + $0xe0] sm:$0xff]   ;;  %v1338_v21 = vld [vmem:[#allocation5 + $0x28] sm:$0xff]  }
  0x74   :  { %1149 = vmatprep.subr.bf16.mxu0 %v1325_v8  ;;  %v1332_v15 = vld [vmem:[#allocation5 + $0x98] sm:$0xff]   ;;  %v1336_v19 = vld [vmem:[#allocation5 + $0xa0] sm:$0xff]   ;;  %v1339_v22 = vld [vmem:[#allocation5 + $0xe8] sm:$0xff]  }
  0x75   :  { %1170 = vmatpush3.bf16.msra.mxu1 %v1324_v7  ;;  %v1340_v23 = vld [vmem:[#allocation5 + $0xa8] sm:$0xff]   ;;  %v1341_v24 = vld [vmem:[#allocation5 + $0x70] sm:$0xff]   ;;  %v1345_v28 = vld [vmem:[#allocation5 + $0x78] sm:$0xff]  }
  0x76   :  { %1171 = vmatprep.subr.bf16.mxu1 %v1327_v10  ;;  %v1342_v25 = vld [vmem:[#allocation5 + $0x30] sm:$0xff]   ;;  %v1346_v29 = vld [vmem:[#allocation5 + $0x38] sm:$0xff]   ;;  %v112_v34 = vld [vmem:[#allocation2] sm:$0xff] }
  0x77   :  { %1150 = vmatpush3.bf16.msra.mxu0 %v1326_v9  ;;  %v1343_v26 = vld [vmem:[#allocation5 + $0xf0] sm:$0xff]   ;;  %v1347_v30 = vld [vmem:[#allocation5 + $0xf8] sm:$0xff]   ;;  %v269_v35 = vpack.c.bf16 %v112_v34, %v112_v34  ;;  %v1349_v36 = vld [vmem:[#allocation5 + $0x140] sm:$0xff]  }
  0x78   :  { %1151 = vmatprep.subr.bf16.mxu0 %v1329_v12  ;;  %v1344_v27 = vld [vmem:[#allocation5 + $0xb0] sm:$0xff]   ;;  %v1348_v33 = vld [vmem:[#allocation5 + $0xb8] sm:$0xff]   ;;  %v115_v37 = vld [vmem:[#allocation2 + $0x18] sm:$0xff] }
  0x79   :  { %1172 = vmatpush3.bf16.msra.mxu1 %v1328_v11  ;;  %v113_v31 = vld [vmem:[#allocation2 + $0x8] sm:$0xff]  ;;  %v272_v38 = vpack.c.bf16 %v115_v37, %v115_v37  ;;  %v1350_v39 = vld [vmem:[#allocation5 + $0x100] sm:$0xff]   ;;  %v114_v40 = vld [vmem:[#allocation2 + $0x10] sm:$0xff] }
  0x7a   :  { %1173 = vmatprep.subr.bf16.mxu1 %v1331_v14  ;;  %v270_v32 = vpack.c.bf16 %v113_v31, %v113_v31  ;;  %v271_v41 = vpack.c.bf16 %v114_v40, %v114_v40  ;;  %v1351_v42 = vld [vmem:[#allocation5 + $0x148] sm:$0xff]   ;;  %v1353_v45 = vld [vmem:[#allocation5 + $0x150] sm:$0xff]   ;;  %v1355_v47 = vld [vmem:[#allocation5 + $0x158] sm:$0xff]  }
  0x7b   :  { %1152 = vmatpush3.bf16.msra.mxu0 %v1330_v13  ;;  %652 = vmatprep.mubr.bf16.mxu1 %v272_v38  ;;  %v1352_v43 = vld [vmem:[#allocation5 + $0x108] sm:$0xff]   ;;  %v1354_v46 = vld [vmem:[#allocation5 + $0x110] sm:$0xff]   ;;  %v1356_v48 = vld [vmem:[#allocation5 + $0x118] sm:$0xff]  }
  0x7c   :  { %1153 = vmatprep.subr.bf16.mxu0 %v1333_v16  ;;  %612 = vmatprep.mubr.bf16.mxu0 %v270_v32  ;;  %v1357_v49 = vld [vmem:[#allocation5 + $0x160] sm:$0xff]   ;;  %v1359_v51 = vld [vmem:[#allocation5 + $0x168] sm:$0xff]   ;;  %v117_v54 = vld [vmem:[#allocation2 + $0x28] sm:$0xff] }
  0x7d   :  { %1174 = vmatpush3.bf16.msra.mxu1 %v1332_v15  ;;  %v1358_v50 = vld [vmem:[#allocation5 + $0x120] sm:$0xff]   ;;  %v1360_v52 = vld [vmem:[#allocation5 + $0x128] sm:$0xff]   ;;  %v1361_v55 = vld [vmem:[#allocation5 + $0x170] sm:$0xff]   ;;  %v274_v56 = vpack.c.bf16 %v117_v54, %v117_v54 }
  0x7e   :  { %1175 = vmatprep.subr.bf16.mxu1 %v1335_v18  ;;  %v1365_v53 = vld [vmem:[#allocation5 + $0x180] sm:$0xff]   ;;  %v118_v57 = vld [vmem:[#allocation2 + $0x30] sm:$0xff]  ;;  %v1362_v59 = vld [vmem:[#allocation5 + $0x130] sm:$0xff]  }
  0x7f   :  { %1154 = vmatpush3.bf16.msra.mxu0 %v1334_v17  ;;  %v275_v58 = vpack.c.bf16 %v118_v57, %v118_v57  ;;  %v1363_v60 = vld [vmem:[#allocation5 + $0x178] sm:$0xff]   ;;  %v116_v62 = vld [vmem:[#allocation2 + $0x20] sm:$0xff] }
  0x80   :  { %1155 = vmatprep.subr.bf16.mxu0 %v1337_v20  ;;  %v1364_v61 = vld [vmem:[#allocation5 + $0x138] sm:$0xff]   ;;  %v273_v63 = vpack.c.bf16 %v116_v62, %v116_v62  ;;  %v1366_v0 = vld [vmem:[#allocation8] sm:$0xff]   ;;  %v1369_v3 = vld [vmem:[#allocation8 + $0x18] sm:$0xff]  }
  0x81   :  { %1176 = vmatpush3.bf16.msra.mxu1 %v1336_v19  ;;  %v1367_v1 = vld [vmem:[#allocation8 + $0x8] sm:$0xff]   ;;  %v1368_v2 = vld [vmem:[#allocation8 + $0x10] sm:$0xff]   ;;  %v1370_v4 = vld [vmem:[#allocation8 + $0x20] sm:$0xff]  }
  0x82   :  { %1177 = vmatprep.subr.bf16.mxu1 %v1339_v22  ;;  %v1371_v5 = vld [vmem:[#allocation8 + $0x28] sm:$0xff]   ;;  %v1372_v6 = vld [vmem:[#allocation8 + $0x30] sm:$0xff]   ;;  %v1373_v7 = vld [vmem:[#allocation8 + $0x38] sm:$0xff]  }
  0x83   :  { %1156 = vmatpush3.bf16.msra.mxu0 %v1338_v21  ;;  %v1374_v8 = vld [vmem:[#allocation10] sm:$0xff]   ;;  %v1375_v9 = vld [vmem:[#allocation10 + $0x8] sm:$0xff]   ;;  %v1376_v10 = vld [vmem:[#allocation10 + $0x10] sm:$0xff]  }
  0x84   :  { %1157 = vmatprep.subr.bf16.mxu0 %v1341_v24  ;;  %v1377_v11 = vld [vmem:[#allocation10 + $0x18] sm:$0xff]   ;;  %v1378_v12 = vld [vmem:[#allocation10 + $0x20] sm:$0xff]   ;;  %v1379_v13 = vld [vmem:[#allocation10 + $0x28] sm:$0xff]  }
  0x85   :  { %1178 = vmatpush3.bf16.msra.mxu1 %v1340_v23  ;;  %v1067_v15 = vld [vmem:[#allocation7] ss:$0 sm:$0xff]  ;;  %v1380_v40 = vld [vmem:[#allocation10 + $0x30] sm:$0xff]  }
  0x86   :  { %1179 = vmatprep.subr.bf16.mxu1 %v1343_v26  ;;  %v1388_v57 = vld [vmem:[#allocation11 + $0x30] sm:$0xff]  }
  0x87   :  { %1158 = vmatpush3.bf16.msra.mxu0 %v1342_v25 }
  0x88   :  { %1159 = vmatprep.subr.bf16.mxu0 %v1345_v28 }
  0x89   :  { %1180 = vmatpush3.bf16.msra.mxu1 %v1344_v27 }
  0x8a   :  { %1181 = vmatprep.subr.bf16.mxu1 %v1347_v30 }
  0x8b   :  { %1160 = vmatpush3.bf16.msra.mxu0 %v1346_v29 }
  0x8c   :  { %1189 = vmatprep.subr.bf16.mxu0 %v1349_v36 }
  0x8d   :  { %1182 = vmatpush3.bf16.msra.mxu1 %v1348_v33 }
  0x8e   :  { %613 = vmatmul.mubr.bf16.vlgmr.msra.gmra.mrb[0].mxu0 %v269_v35  ;;  %1240 = vmatprep.subr.bf16.mxu1 %v1566_v44 }
  0x8f   :  { %1190 = vmatpush3.bf16.msra.mxu0 %v1350_v39  ;;  %692 = vmatprep.mubr.bf16.mxu0 %v274_v56 }
  0x90   :  { %653 = vmatmul.mubr.bf16.vlgmr.msra.gmra.mrb[0].mxu1 %v271_v41  ;;  %1191 = vmatprep.subr.bf16.mxu0 %v1351_v42  ;;  %v1381_v41 = vld [vmem:[#allocation10 + $0x38] sm:$0xff]   ;;  %v1382_v42 = vld [vmem:[#allocation11] sm:$0xff]  }
  0x91   :  { %1242 = vmatprep.mubr.msk.bf16.mxu1 %vm1567_vm0, %v1566_v44  ;;  %1241 = vmatpush3.bf16.msra.mxu1 %v1365_v53 }
  0x92   :  { %1246 = vmatprep.subr.bf16.mxu1 %v1566_v44 }
  0x93   :  { %1192 = vmatpush3.bf16.msra.mxu0 %v1352_v43  ;;  %v1383_v43 = vld [vmem:[#allocation11 + $0x8] sm:$0xff]  }
  0x94   :  { %1193 = vmatprep.subr.bf16.mxu0 %v1353_v45  ;;  %v1384_v45 = vld [vmem:[#allocation11 + $0x10] sm:$0xff]  }
  0x97   :  { %1194 = vmatpush3.bf16.msra.mxu0 %v1354_v46  ;;  %v1385_v46 = vld [vmem:[#allocation11 + $0x18] sm:$0xff]  }
  0x98   :  { %1195 = vmatprep.subr.bf16.mxu0 %v1355_v47  ;;  %1243 = vmatmul.mubr.msk.bf16.vlgmr.msra.gmra.mrb[4].mxu1 %vm576_vm1, %v275_v58  ;;  %v1386_v47 = vld [vmem:[#allocation11 + $0x20] sm:$0xff]   ;;  %v1389_v58 = vld [vmem:[#allocation11 + $0x38] sm:$0xff]  }
  0x99   :  { %1262 = vmatprep.mubr.msk.bf16.mxu1 %vm1567_vm0, %v1566_v44  ;;  %1247 = vmatpush3.bf16.msra.mxu1 %v1366_v0 }
  0x9a   :  { %1248 = vmatprep.subr.bf16.mxu1 %v1566_v44 }
  0x9b   :  { %1196 = vmatpush3.bf16.msra.mxu0 %v1356_v48  ;;  %v1387_v48 = vld [vmem:[#allocation11 + $0x28] sm:$0xff]  }
  0x9c   :  { %1197 = vmatprep.subr.bf16.mxu0 %v1357_v49  ;;  %v1118_v49 = vld [vmem:[%s1761_s4] ss:$0 sm:$0xff] }
  0x9d   :  { %1249 = vmatpush3.bf16.msra.mxu1 %v1367_v1 }
  0x9e   :  { %1250 = vmatprep.subr.bf16.mxu1 %v1566_v44 }
  0x9f   :  { %1198 = vmatpush3.bf16.msra.mxu0 %v1358_v50 }
  0xa0   :  { %1199 = vmatprep.subr.bf16.mxu0 %v1359_v51 }
  0xa1   :  { %1251 = vmatpush3.bf16.msra.mxu1 %v1368_v2 }
  0xa2   :  { %1252 = vmatprep.subr.bf16.mxu1 %v1566_v44 }
  0xa3   :  { %1200 = vmatpush3.bf16.msra.mxu0 %v1360_v52 }
  0xa4   :  { %1201 = vmatprep.subr.bf16.mxu0 %v1361_v55 }
  0xa5   :  { %1253 = vmatpush3.bf16.msra.mxu1 %v1369_v3  ;;  %v1136_v3 = vld [vmem:[%s1765_s8] ss:$0 sm:$0xff] }
  0xa6   :  { %1254 = vmatprep.subr.bf16.mxu1 %v1566_v44 }
  0xa7   :  { %1202 = vmatpush3.bf16.msra.mxu0 %v1362_v59  ;;  %v1127_v59 = vld [vmem:[%s1763_s6] ss:$0 sm:$0xff]  ;;  %s1568_s6 = smov [#allocation13]  }
  0xa8   :  { %1203 = vmatprep.subr.bf16.mxu0 %v1363_v60  ;;  %s1055_s8 = sshll.u32 %s1568_s6, 4  ;;  %s1056_s8 = int_to_ptr.vmem [resolvable:$true] %s1055_s8 }
  0xa9   :  { %1255 = vmatpush3.bf16.msra.mxu1 %v1370_v4  ;;  %s1526_s18 = scalar_lea.vmem %s1056_s8, 128  ;;  %p1531_p7 = scmp.lt.s32.totalorder %s1056_s8, %s1056_s8 }
  0xaa   :  { %1256 = vmatprep.subr.bf16.mxu1 %v1566_v44  ;;  %p1527_p6 = scmp.ne.s32.totalorder %s1056_s8, %s1526_s18  ;;  %p1532_p8 = scmp.lt.s32.totalorder %s1526_s18, %s1526_s18 }
  0xab   :  { %1204 = vmatpush3.bf16.msra.mxu0 %v1364_v61 }
  0xac   :  { %1266 = vmatprep.subr.bf16.mxu0 %v1566_v44  ;;  %p1533_p9 = por %p1532_p8, %p1531_p7 }
  0xad   :  { %1257 = vmatpush3.bf16.msra.mxu1 %v1371_v5 }
  0xae   :  { %693 = vmatmul.mubr.bf16.vlgmr.msra.gmra.mrb[4].mxu0 %v273_v63  ;;  %1258 = vmatprep.subr.bf16.mxu1 %v1566_v44  ;;  %p1534_p10 = pnand %p1533_p9, %p1527_p6 }
  0xaf   :  { %1282 = vmatprep.mubr.msk.bf16.mxu0 %vm1567_vm0, %v1566_v44  ;;  %1267 = vmatpush3.bf16.msra.mxu0 %v1374_v8 }
  0xb0   :  { %1268 = vmatprep.subr.bf16.mxu0 %v1566_v44 }
  0xb1   :  { %1259 = vmatpush3.bf16.msra.mxu1 %v1372_v6 }
  0xb2   :  { %1260 = vmatprep.subr.bf16.mxu1 %v1566_v44 }
  0xb3   :  { %1269 = vmatpush3.bf16.msra.mxu0 %v1375_v9 }
  0xb4   :  { %1270 = vmatprep.subr.bf16.mxu0 %v1566_v44 }
  0xb5   :  { %1261 = vmatpush3.bf16.msra.mxu1 %v1373_v7 }
  0xb6   :  { %1286 = vmatprep.subr.bf16.mxu1 %v1566_v44 }
  0xb7   :  { %1271 = vmatpush3.bf16.msra.mxu0 %v1376_v10 }
  0xb8   :  { %1272 = vmatprep.subr.bf16.mxu0 %v1566_v44 }
  0xbb   :  { %1273 = vmatpush3.bf16.msra.mxu0 %v1377_v11 }
  0xbc   :  { %1274 = vmatprep.subr.bf16.mxu0 %v1566_v44 }
  0xbf   :  { %1275 = vmatpush3.bf16.msra.mxu0 %v1378_v12 }
  0xc0   :  { %1276 = vmatprep.subr.bf16.mxu0 %v1566_v44 }
  0xc3   :  { %1277 = vmatpush3.bf16.msra.mxu0 %v1379_v13 }
  0xc4   :  { %1278 = vmatprep.subr.bf16.mxu0 %v1566_v44 }
  0xc7   :  { %1279 = vmatpush3.bf16.msra.mxu0 %v1380_v40 }
  0xc8   :  { %1280 = vmatprep.subr.bf16.mxu0 %v1566_v44 }
  0xcb   :  { %1281 = vmatpush3.bf16.msra.mxu0 %v1381_v41 }
 0x161   :  { %v1161_v14 = vpop.f32.mrb[0].mxu0 }
 0x162   :  { %v1162_v16 = vpop.f32.mrb[1].mxu0 }
 0x163   :  { %v1163_v17 = vadd.f32 %v1162_v16, %v1161_v14  ;;  %v1164_v18 = vpop.f32.mrb[2].mxu0  ;;  %v1183_v19 = vpop.f32.mrb[0].mxu1 }
 0x164   :  { %v1165_v20 = vpop.f32.mrb[3].mxu0  ;;  %v1184_v22 = vpop.f32.mrb[1].mxu1 }
 0x165   :  { %v615_v21 = vadd.f32 %v1163_v17, %v1067_v15  ;;  %v1185_v23 = vadd.f32 %v1184_v22, %v1183_v19  ;;  %v1186_v24 = vpop.f32.mrb[2].mxu1 }
 0x166   :  { %v1187_v25 = vpop.f32.mrb[3].mxu1 }
 0x167   :  { %v655_v26 = vadd.f32 %v1185_v23, %v615_v21 }
 0x16b   :  { %v734_v27 = vpop.f32.mrb[4].mxu1 }
 0x16c   :  { %v1244_v28 = vpop.f32.mrb[5].mxu1 }
 0x16d   :  { %v737_v29 = vpop.f32.mrb[6].mxu1 }
 0x16e   :  { %v1245_v30 = vpop.f32.mrb[7].mxu1 }
 0x181   :  { %v1205_v31 = vpop.f32.mrb[4].mxu0 }
 0x182   :  { %v1206_v32 = vpop.f32.mrb[5].mxu0 }
 0x183   :  { %v1207_v33 = vadd.f32 %v1206_v32, %v1205_v31  ;;  %v1208_v34 = vpop.f32.mrb[6].mxu0 }
 0x184   :  { %v1209_v35 = vpop.f32.mrb[7].mxu0 }
 0x185   :  { %v695_v36 = vadd.f32 %v1207_v33, %v655_v26 }
 0x187   :  { %v735_v37 = vadd.f32 %v734_v27, %v695_v36 }
 0x189   :  { %v740_v38 = vmax.f32 %v735_v37, 0.0 }
 0x18b   :  { %v741_v39 = vpack.c.bf16 %v740_v38, %v740_v38 }
 0x18d   :  { %1263 = vmatmul.mubr.bf16.vlgmr.msra.gmra.mrb[8].mxu1 %v741_v39 }
 0x18e   :  { %1302 = vmatprep.mubr.msk.bf16.mxu1 %vm1567_vm0, %v1566_v44  ;;  %1287 = vmatpush3.bf16.msra.mxu1 %v1382_v42 }
 0x18f   :  { %1288 = vmatprep.subr.bf16.mxu1 %v1566_v44 }
 0x192   :  { %1289 = vmatpush3.bf16.msra.mxu1 %v1383_v43 }
 0x193   :  { %1290 = vmatprep.subr.bf16.mxu1 %v1566_v44 }
 0x196   :  { %1291 = vmatpush3.bf16.msra.mxu1 %v1384_v45 }
 0x197   :  { %1292 = vmatprep.subr.bf16.mxu1 %v1566_v44 }
 0x19a   :  { %1293 = vmatpush3.bf16.msra.mxu1 %v1385_v46 }
 0x19b   :  { %1294 = vmatprep.subr.bf16.mxu1 %v1566_v44 }
 0x19e   :  { %1295 = vmatpush3.bf16.msra.mxu1 %v1386_v47 }
 0x19f   :  { %1296 = vmatprep.subr.bf16.mxu1 %v1566_v44 }
 0x1a2   :  { %1297 = vmatpush3.bf16.msra.mxu1 %v1387_v48 }
 0x1a3   :  { %1298 = vmatprep.subr.bf16.mxu1 %v1566_v44 }
 0x1a6   :  { %1299 = vmatpush3.bf16.msra.mxu1 %v1388_v57 }
 0x1a7   :  { %1300 = vmatprep.subr.bf16.mxu1 %v1566_v44 }
 0x1aa   :  { %1301 = vmatpush3.bf16.msra.mxu1 %v1389_v58 }
 0x260   :  { %v830_v50 = vpop.f32.mrb[8].mxu1 }
 0x261   :  { %v831_v51 = vadd.f32 %v1118_v49, %v830_v50  ;;  %v1264_v52 = vpop.f32.mrb[9].mxu1 }
 0x262   :  { %v833_v53 = vpop.f32.mrb[10].mxu1 }
 0x263   :  { %v836_v54 = vmax.f32 %v831_v51, 0.0  ;;  %v1265_v55 = vpop.f32.mrb[11].mxu1 }
 0x265   :  { %v837_v56 = vpack.c.bf16 %v836_v54, %v836_v54 }
 0x267   :  { %1283 = vmatmul.mubr.bf16.vlgmr.msra.gmra.mrb[8].mxu0 %v837_v56 }
 0x33a   :  { %v926_v60 = vpop.f32.mrb[8].mxu0 }
 0x33b   :  { %v927_v61 = vadd.f32 %v1127_v59, %v926_v60  ;;  %v1284_v62 = vpop.f32.mrb[9].mxu0 }
 0x33c   :  { %v929_v63 = vpop.f32.mrb[10].mxu0 }
 0x33d   :  { %v932_v0 = vmax.f32 %v927_v61, 0.0  ;;  %v1285_v1 = vpop.f32.mrb[11].mxu0 }
 0x33f   :  { %v933_v2 = vpack.c.bf16 %v932_v0, %v932_v0 }
 0x341   :  { %1303 = vmatmul.mubr.bf16.vlgmr.msra.gmra.mrb[12].mxu1 %v933_v2 }
 0x414   :  { %v1022_v4 = vpop.f32.mrb[12].mxu1 }
 0x415   :  { %v1023_v44 = vadd.f32 %v1136_v3, %v1022_v4  ;;  %v1304_v5 = vpop.f32.mrb[13].mxu1 }
 0x416   :  { %v1025_v6 = vpop.f32.mrb[14].mxu1 }
 0x417   :  { %v1028_v7 = vmax.f32 %v1023_v44, 0.0  ;;  %v1305_v8 = vpop.f32.mrb[15].mxu1 }
 0x419   :  { %v1029_v9 = vrot.slane %v1028_v7, 4 }
 0x41b   :  { %v1030_v10 = vmax.f32 %v1028_v7, %v1029_v9 }
 0x41d   :  { %v1031_v11 = vrot.slane %v1030_v10, 2 }
 0x41f   :  { %v1032_v12 = vmax.f32 %v1030_v10, %v1031_v11 }
 0x421   :  { %v1033_v13 = vrot.slane %v1032_v12, 1 }
 0x423   :  { %v1034_v14 = vmax.f32 %v1032_v12, %v1033_v13 }
 0x425   :  { %v1035_v15 = vsub.f32 %v1028_v7, %v1034_v14 }
 0x427   :  { %v1036_v16 = vmul.f32 1.442695, %v1035_v15 }
 0x429   :  { %1390 = vpow2.f32 %v1036_v16 }
 0x433   :  { %v1391_v17 = vpop.eup %1390 }
 0x434   :  { %v1038_v18 = vrot.slane %v1391_v17, 4 }
 0x436   :  { %v1039_v19 = vadd.f32 %v1391_v17, %v1038_v18 }
 0x438   :  { %v1040_v20 = vrot.slane %v1039_v19, 2 }
 0x43a   :  { %v1041_v21 = vadd.f32 %v1040_v20, %v1039_v19 }
 0x43c   :  { %v1042_v22 = vrot.slane %v1041_v21, 1 }
 0x43e   :  { %v1043_v23 = vadd.f32 %v1042_v22, %v1041_v21 }
 0x440   :  { %1392 = vlog2.f32 %v1043_v23 }
 0x44a   :  { %v1393_v24 = vpop.eup %1392 }
 0x44b   :  { %v1045_v25 = vmul.f32 0.6931472, %v1393_v24 }
 0x44d   :  { %v1046_v26 = vsub.f32 %v1035_v15, %v1045_v25 }
 0x44f   :  { %1048 = vst.msk [vmem:[#allocation13] sm:$0xff] %vm1047_vm2, %v1046_v26 }
 0x450   :  { %1537 = shalt.err (!%p1534_p10)
}
 0x451   :  { %s1538_s23 = scalar_lea.hbm %s1766_s9, 128 }
 0x452   :  { %p1539_p11 = scmp.ne.s32.totalorder %s1766_s9, %s1538_s23  ;;  %p1542_p12 = scmp.lt.u32.totalorder %s1538_s23, %s1766_s9 }
 0x454   :  { %p1544_p13 = pnand %p1542_p12, %p1539_p11 }
 0x456   :  { %1547 = shalt.err (!%p1544_p13)
}
 0x457   :  { %1058 = dma.vmem_to_hbm [thread:$0]  %s1056_s8, 128, %s1766_s9, [#allocation4]  }
 0x458   :  { %1556 = dma.done.wait [#allocation4], 128  }
 0x459   :  { %1557 = vsyncadd [#allocation4], 4294967168 }
 0x45a   :  { %1062 = vsyncpa [#allocation3], 1 }
 0x45b   :  { %1063 = vsyncpa [#allocation6], 1 }
 0x45c   :  { %1064 = vsyncpa [#allocation9], 1 }
 0x45d   :  { %1065 = vsyncpa [#allocation12], 1 }
 0x45e   :  { %1066 = vsyncpa [#allocation4], 1 }

</bundles_post_ra>
